<compile_context>
chip_gen: v5e
topology: v5e:2x2
jax: 0.10.0
libtpu: 0.0.40
codegen_flags: <defaults>
</compile_context>

<pallas_src>
import functools
import math

import jax
import jax.numpy as jnp
from jax import lax
from jax.experimental import pallas as pl
from jax.experimental.pallas import tpu as pltpu


def fused_mha_kernel(q_ref, k_ref, v_ref,
                     wq_ref, bq_ref, wk_ref, bk_ref, wv_ref, bv_ref,
                     wo_ref, bo_ref, mask_ref, o_ref,
                     *, n_heads, d_k, compute_dtype):
    cd = compute_dtype
    q = q_ref[0].astype(cd)          # (S, D)
    k = k_ref[0].astype(cd)          # (S, D)
    v = v_ref[0].astype(cd)          # (S, D)

    # Head-fused projections: one (S, D) @ (D, H*d_k) matmul per activation.
    nq = jnp.dot(q, wq_ref[...].astype(cd),
                 preferred_element_type=jnp.float32) + bq_ref[...]   # (S, H*d_k)
    nk = jnp.dot(k, wk_ref[...].astype(cd),
                 preferred_element_type=jnp.float32) + bk_ref[...]
    nv = jnp.dot(v, wv_ref[...].astype(cd),
                 preferred_element_type=jnp.float32) + bv_ref[...]

    scale = jnp.float32(1.0 / math.sqrt(d_k))
    mask = mask_ref[...]             # (S, S), additive (arbitrary module mask)

    head_outs = []
    for h in range(n_heads):         # static unroll; H is small
        lo = h * d_k
        qh = nq[:, lo:lo + d_k].astype(cd)   # (S, d_k)
        kh = nk[:, lo:lo + d_k].astype(cd)
        vh = nv[:, lo:lo + d_k].astype(cd)

        # score = Q K^T / sqrt(d_k) + mask, contracting d_k on both operands
        # (no explicit transpose / relayout of kh).
        s = lax.dot_general(qh, kh,
                            dimension_numbers=(((1,), (1,)), ((), ())),
                            preferred_element_type=jnp.float32)       # (S, S)
        s = s * scale + mask

        # softmax over the key axis, in f32; divide goes to the EUP slot.
        s = s - jnp.max(s, axis=-1, keepdims=True)
        p = jnp.exp(s)
        p = p * pl.reciprocal(jnp.sum(p, axis=-1, keepdims=True), approx=True)

        head_outs.append(jnp.dot(p.astype(cd), vh,
                                 preferred_element_type=jnp.float32))  # (S, d_k)

    # Heads land directly in the concatenated (S, H*d_k) layout (no HBM round trip).
    concat = jnp.concatenate(head_outs, axis=-1)                       # (S, D)

    # Fused output projection.
    out = jnp.dot(concat.astype(cd), wo_ref[...].astype(cd),
                  preferred_element_type=jnp.float32) + bo_ref[...]    # (S, D)
    o_ref[0] = out.astype(o_ref.dtype)


def multi_head_attention(Q, K, V, params, mask, *, compute_dtype=jnp.float32):
    """params: wq/wk/wv (H, D, d_k), bq/bk/bv (H, 1, d_k), wo (D, D), bo (1, D)."""
    B, S, D = Q.shape
    H, _, d_k = params["wq"].shape
    assert H * d_k == D

    # One-time weight layout prep (outside the kernel): stack per-head (D, d_k)
    # projection matrices along the lane axis -> (D, H*d_k); biases -> (1, H*d_k).
    def fuse_w(w):
        return jnp.transpose(w, (1, 0, 2)).reshape(D, H * d_k)

    def fuse_b(b):
        return b.reshape(1, H * d_k)

    wq, wk, wv = fuse_w(params["wq"]), fuse_w(params["wk"]), fuse_w(params["wv"])
    bq, bk, bv = fuse_b(params["bq"]), fuse_b(params["bk"]), fuse_b(params["bv"])

    kernel = functools.partial(fused_mha_kernel,
                               n_heads=H, d_k=d_k, compute_dtype=compute_dtype)

    act_spec = pl.BlockSpec((1, S, D), lambda b: (b, 0, 0))
    w_spec = pl.BlockSpec((D, H * d_k), lambda b: (0, 0))
    b_spec = pl.BlockSpec((1, H * d_k), lambda b: (0, 0))

    # TODO(synk): for very long S, add a query-tile grid axis with an online-softmax
    # accumulator and generate the causal mask in-kernel (broadcasted_iota) so the
    # (S,S) score/mask footprint fits v7x's 64 MiB VMEM.
    return pl.pallas_call(
        kernel,
        out_shape=jax.ShapeDtypeStruct((B, S, D), jnp.float32),
        grid=(B,),
        in_specs=[
            act_spec, act_spec, act_spec,                 # Q, K, V
            w_spec, b_spec,                               # WQ (fused), bQ
            w_spec, b_spec,                               # WK, bK
            w_spec, b_spec,                               # WV, bV
            pl.BlockSpec((D, D), lambda b: (0, 0)),       # WO (pre-transposed)
            pl.BlockSpec((1, D), lambda b: (0, 0)),       # bO
            pl.BlockSpec((S, S), lambda b: (0, 0)),       # additive mask
        ],
        out_specs=pl.BlockSpec((1, S, D), lambda b: (b, 0, 0)),
        compiler_params=pltpu.CompilerParams(
            dimension_semantics=("parallel",)),           # batch shards across TCs
    )(Q, K, V, wq, bq, wk, bk, wv, bv, params["wo"], params["bo"], mask)


def reference(Q, K, V, params, mask):
    """Pure-JAX reference mirroring the PyTorch forward."""
    H, _, d_k = params["wq"].shape
    outs = []
    for h in range(H):
        nq = Q @ params["wq"][h] + params["bq"][h, 0]
        nk = K @ params["wk"][h] + params["bk"][h, 0]
        nv = V @ params["wv"][h] + params["bv"][h, 0]
        score = jnp.einsum("bqd,bkd->bqk", nq, nk) / jnp.sqrt(jnp.float32(d_k))
        score = score + mask[None, :, :]
        score = jax.nn.softmax(score, axis=2)
        outs.append(jnp.einsum("bqk,bkd->bqd", score, nv))
    cat = jnp.concatenate(outs, axis=2)
    return cat @ params["wo"] + params["bo"][0]


if __name__ == "__main__":
    B, S, D, H = 2, 8, 32, 4
    d_k = D // H

    key = jax.random.PRNGKey(0)
    ks = jax.random.split(key, 12)
    scale = 1.0 / math.sqrt(D)

    params = {
        "wq": jax.random.uniform(ks[0], (H, D, d_k), jnp.float32, -scale, scale),
        "bq": jax.random.uniform(ks[1], (H, 1, d_k), jnp.float32, -scale, scale),
        "wk": jax.random.uniform(ks[2], (H, D, d_k), jnp.float32, -scale, scale),
        "bk": jax.random.uniform(ks[3], (H, 1, d_k), jnp.float32, -scale, scale),
        "wv": jax.random.uniform(ks[4], (H, D, d_k), jnp.float32, -scale, scale),
        "bv": jax.random.uniform(ks[5], (H, 1, d_k), jnp.float32, -scale, scale),
        "wo": jax.random.uniform(ks[6], (D, D), jnp.float32, -scale, scale),
        "bo": jax.random.uniform(ks[7], (1, D), jnp.float32, -scale, scale),
    }

    Q = jax.random.normal(ks[8], (B, S, D), jnp.float32)
    K = jax.random.normal(ks[9], (B, S, D), jnp.float32)
    V = jax.random.normal(ks[10], (B, S, D), jnp.float32)

    # Additive attention mask (causal, large negative above diagonal), shape (S, S).
    mask = jnp.where(jnp.tril(jnp.ones((S, S), jnp.bool_)), 0.0, -1e9).astype(jnp.float32)

    # Default f32 MXU operands (safe on all generations); pass
    # compute_dtype=jnp.bfloat16 on v6e/v7x for the bf16 MXU path.
    out = multi_head_attention(Q, K, V, params, mask)
    out = jax.block_until_ready(out)

    ref = reference(Q, K, V, params, mask)
    assert out.shape == (B, S, D)
    assert jnp.allclose(out, ref, atol=1e-2, rtol=1e-2), "mismatch vs reference"

    print("KERNEL_OK")
</pallas_src>

<mosaic_0001>
module attributes {stable_mosaic.version = 11 : i64} {
  func.func @fused_mha_kernel(%arg0: i32, %arg1: memref<1x8x32xf32, #tpu.memory_space<vmem>>, %arg2: memref<1x8x32xf32, #tpu.memory_space<vmem>>, %arg3: memref<1x8x32xf32, #tpu.memory_space<vmem>>, %arg4: memref<32x32xf32, #tpu.memory_space<vmem>>, %arg5: memref<1x32xf32, #tpu.memory_space<vmem>>, %arg6: memref<32x32xf32, #tpu.memory_space<vmem>>, %arg7: memref<1x32xf32, #tpu.memory_space<vmem>>, %arg8: memref<32x32xf32, #tpu.memory_space<vmem>>, %arg9: memref<1x32xf32, #tpu.memory_space<vmem>>, %arg10: memref<32x32xf32, #tpu.memory_space<vmem>>, %arg11: memref<1x32xf32, #tpu.memory_space<vmem>>, %arg12: memref<8x8xf32, #tpu.memory_space<vmem>>, %arg13: memref<1x8x32xf32, #tpu.memory_space<vmem>>) attributes {dimension_semantics = [#tpu.dimension_semantics<parallel>], iteration_bounds = array<i64: 2>, scalar_prefetch = 0 : i64, scratch_operands = 0 : i64, tpu.core_type = #tpu.core_type<tc>, window_params = [{transform_indices = @transform_0, window_bounds = array<i64: 1, 8, 32>}, {transform_indices = @transform_1, window_bounds = array<i64: 1, 8, 32>}, {transform_indices = @transform_2, window_bounds = array<i64: 1, 8, 32>}, {pipeline_mode = #tpu.pipeline_mode<synchronous>, transform_indices = @transform_3, window_bounds = array<i64: 32, 32>}, {pipeline_mode = #tpu.pipeline_mode<synchronous>, transform_indices = @transform_4, window_bounds = array<i64: 1, 32>}, {pipeline_mode = #tpu.pipeline_mode<synchronous>, transform_indices = @transform_5, window_bounds = array<i64: 32, 32>}, {pipeline_mode = #tpu.pipeline_mode<synchronous>, transform_indices = @transform_6, window_bounds = array<i64: 1, 32>}, {pipeline_mode = #tpu.pipeline_mode<synchronous>, transform_indices = @transform_7, window_bounds = array<i64: 32, 32>}, {pipeline_mode = #tpu.pipeline_mode<synchronous>, transform_indices = @transform_8, window_bounds = array<i64: 1, 32>}, {pipeline_mode = #tpu.pipeline_mode<synchronous>, transform_indices = @transform_9, window_bounds = array<i64: 32, 32>}, {pipeline_mode = #tpu.pipeline_mode<synchronous>, transform_indices = @transform_10, window_bounds = array<i64: 1, 32>}, {pipeline_mode = #tpu.pipeline_mode<synchronous>, transform_indices = @transform_11, window_bounds = array<i64: 8, 8>}, {transform_indices = @transform_12, window_bounds = array<i64: 1, 8, 32>}]} {
    %c0 = arith.constant 0 : index
    %c0_0 = arith.constant 0 : index
    %c0_1 = arith.constant 0 : index
    %0 = vector.load %arg1[%c0, %c0_0, %c0_1] : memref<1x8x32xf32, #tpu.memory_space<vmem>>, vector<1x8x32xf32>
    %1 = vector.shape_cast %0 : vector<1x8x32xf32> to vector<8x32xf32>
    %c0_2 = arith.constant 0 : index
    %c0_3 = arith.constant 0 : index
    %c0_4 = arith.constant 0 : index
    %2 = vector.load %arg2[%c0_2, %c0_3, %c0_4] : memref<1x8x32xf32, #tpu.memory_space<vmem>>, vector<1x8x32xf32>
    %3 = vector.shape_cast %2 : vector<1x8x32xf32> to vector<8x32xf32>
    %c0_5 = arith.constant 0 : index
    %c0_6 = arith.constant 0 : index
    %c0_7 = arith.constant 0 : index
    %4 = vector.load %arg3[%c0_5, %c0_6, %c0_7] : memref<1x8x32xf32, #tpu.memory_space<vmem>>, vector<1x8x32xf32>
    %5 = vector.shape_cast %4 : vector<1x8x32xf32> to vector<8x32xf32>
    %c0_8 = arith.constant 0 : index
    %c0_9 = arith.constant 0 : index
    %6 = vector.load %arg4[%c0_8, %c0_9] : memref<32x32xf32, #tpu.memory_space<vmem>>, vector<32x32xf32>
    %cst = arith.constant dense<0.000000e+00> : vector<8x32xf32>
    %7 = tpu.matmul %1, %6, %cst {dimension_numbers = #tpu.dot_dimension_numbers<[1], [0], [0], [1], [0, 0, 1, 1], [], []>} : vector<8x32xf32>, vector<32x32xf32>, vector<8x32xf32> -> vector<8x32xf32>
    %c0_10 = arith.constant 0 : index
    %c0_11 = arith.constant 0 : index
    %8 = vector.load %arg5[%c0_10, %c0_11] : memref<1x32xf32, #tpu.memory_space<vmem>>, vector<1x32xf32>
    %9 = vector.broadcast %8 : vector<1x32xf32> to vector<8x32xf32>
    %10 = arith.addf %7, %9 : vector<8x32xf32>
    %c0_12 = arith.constant 0 : index
    %c0_13 = arith.constant 0 : index
    %11 = vector.load %arg6[%c0_12, %c0_13] : memref<32x32xf32, #tpu.memory_space<vmem>>, vector<32x32xf32>
    %cst_14 = arith.constant dense<0.000000e+00> : vector<8x32xf32>
    %12 = tpu.matmul %3, %11, %cst_14 {dimension_numbers = #tpu.dot_dimension_numbers<[1], [0], [0], [1], [0, 0, 1, 1], [], []>} : vector<8x32xf32>, vector<32x32xf32>, vector<8x32xf32> -> vector<8x32xf32>
    %c0_15 = arith.constant 0 : index
    %c0_16 = arith.constant 0 : index
    %13 = vector.load %arg7[%c0_15, %c0_16] : memref<1x32xf32, #tpu.memory_space<vmem>>, vector<1x32xf32>
    %14 = vector.broadcast %13 : vector<1x32xf32> to vector<8x32xf32>
    %15 = arith.addf %12, %14 : vector<8x32xf32>
    %c0_17 = arith.constant 0 : index
    %c0_18 = arith.constant 0 : index
    %16 = vector.load %arg8[%c0_17, %c0_18] : memref<32x32xf32, #tpu.memory_space<vmem>>, vector<32x32xf32>
    %cst_19 = arith.constant dense<0.000000e+00> : vector<8x32xf32>
    %17 = tpu.matmul %5, %16, %cst_19 {dimension_numbers = #tpu.dot_dimension_numbers<[1], [0], [0], [1], [0, 0, 1, 1], [], []>} : vector<8x32xf32>, vector<32x32xf32>, vector<8x32xf32> -> vector<8x32xf32>
    %c0_20 = arith.constant 0 : index
    %c0_21 = arith.constant 0 : index
    %18 = vector.load %arg9[%c0_20, %c0_21] : memref<1x32xf32, #tpu.memory_space<vmem>>, vector<1x32xf32>
    %19 = vector.broadcast %18 : vector<1x32xf32> to vector<8x32xf32>
    %20 = arith.addf %17, %19 : vector<8x32xf32>
    %c0_22 = arith.constant 0 : index
    %c0_23 = arith.constant 0 : index
    %21 = vector.load %arg12[%c0_22, %c0_23] : memref<8x8xf32, #tpu.memory_space<vmem>>, vector<8x8xf32>
    %22 = vector.extract_strided_slice %10 {offsets = [0, 0], sizes = [8, 8], strides = [1, 1]} : vector<8x32xf32> to vector<8x8xf32>
    %23 = vector.extract_strided_slice %15 {offsets = [0, 0], sizes = [8, 8], strides = [1, 1]} : vector<8x32xf32> to vector<8x8xf32>
    %24 = vector.extract_strided_slice %20 {offsets = [0, 0], sizes = [8, 8], strides = [1, 1]} : vector<8x32xf32> to vector<8x8xf32>
    %cst_24 = arith.constant dense<0.000000e+00> : vector<8x8xf32>
    %25 = tpu.matmul %22, %23, %cst_24 {dimension_numbers = #tpu.dot_dimension_numbers<[1], [1], [0], [0], [0, 0, 1, 0], [], []>} : vector<8x8xf32>, vector<8x8xf32>, vector<8x8xf32> -> vector<8x8xf32>
    %cst_25 = arith.constant 0.353553385 : f32
    %26 = vector.broadcast %cst_25 : f32 to vector<8x8xf32>
    %27 = arith.mulf %25, %26 : vector<8x8xf32>
    %28 = arith.addf %27, %21 : vector<8x8xf32>
    %cst_26 = arith.constant dense<0xFF800000> : vector<8xf32>
    %29 = vector.multi_reduction <maximumf>, %28, %cst_26 [1] : vector<8x8xf32> to vector<8xf32>
    %30 = vector.shape_cast %29 : vector<8xf32> to vector<8x1xf32>
    %31 = vector.broadcast %30 : vector<8x1xf32> to vector<8x8xf32>
    %32 = arith.subf %28, %31 : vector<8x8xf32>
    %33 = math.exp %32 : vector<8x8xf32>
    %cst_27 = arith.constant dense<0.000000e+00> : vector<8xf32>
    %34 = vector.multi_reduction <add>, %33, %cst_27 [1] : vector<8x8xf32> to vector<8xf32>
    %35 = vector.shape_cast %34 : vector<8xf32> to vector<8x1xf32>
    %36 = tpu.reciprocal %35 {approx = true} : vector<8x1xf32> -> vector<8x1xf32>
    %37 = vector.broadcast %36 : vector<8x1xf32> to vector<8x8xf32>
    %38 = arith.mulf %33, %37 : vector<8x8xf32>
    %cst_28 = arith.constant dense<0.000000e+00> : vector<8x8xf32>
    %39 = tpu.matmul %38, %24, %cst_28 {dimension_numbers = #tpu.dot_dimension_numbers<[1], [0], [0], [1], [0, 0, 1, 1], [], []>} : vector<8x8xf32>, vector<8x8xf32>, vector<8x8xf32> -> vector<8x8xf32>
    %40 = vector.extract_strided_slice %10 {offsets = [0, 8], sizes = [8, 8], strides = [1, 1]} : vector<8x32xf32> to vector<8x8xf32>
    %41 = vector.extract_strided_slice %15 {offsets = [0, 8], sizes = [8, 8], strides = [1, 1]} : vector<8x32xf32> to vector<8x8xf32>
    %42 = vector.extract_strided_slice %20 {offsets = [0, 8], sizes = [8, 8], strides = [1, 1]} : vector<8x32xf32> to vector<8x8xf32>
    %cst_29 = arith.constant dense<0.000000e+00> : vector<8x8xf32>
    %43 = tpu.matmul %40, %41, %cst_29 {dimension_numbers = #tpu.dot_dimension_numbers<[1], [1], [0], [0], [0, 0, 1, 0], [], []>} : vector<8x8xf32>, vector<8x8xf32>, vector<8x8xf32> -> vector<8x8xf32>
    %cst_30 = arith.constant 0.353553385 : f32
    %44 = vector.broadcast %cst_30 : f32 to vector<8x8xf32>
    %45 = arith.mulf %43, %44 : vector<8x8xf32>
    %46 = arith.addf %45, %21 : vector<8x8xf32>
    %cst_31 = arith.constant dense<0xFF800000> : vector<8xf32>
    %47 = vector.multi_reduction <maximumf>, %46, %cst_31 [1] : vector<8x8xf32> to vector<8xf32>
    %48 = vector.shape_cast %47 : vector<8xf32> to vector<8x1xf32>
    %49 = vector.broadcast %48 : vector<8x1xf32> to vector<8x8xf32>
    %50 = arith.subf %46, %49 : vector<8x8xf32>
    %51 = math.exp %50 : vector<8x8xf32>
    %cst_32 = arith.constant dense<0.000000e+00> : vector<8xf32>
    %52 = vector.multi_reduction <add>, %51, %cst_32 [1] : vector<8x8xf32> to vector<8xf32>
    %53 = vector.shape_cast %52 : vector<8xf32> to vector<8x1xf32>
    %54 = tpu.reciprocal %53 {approx = true} : vector<8x1xf32> -> vector<8x1xf32>
    %55 = vector.broadcast %54 : vector<8x1xf32> to vector<8x8xf32>
    %56 = arith.mulf %51, %55 : vector<8x8xf32>
    %cst_33 = arith.constant dense<0.000000e+00> : vector<8x8xf32>
    %57 = tpu.matmul %56, %42, %cst_33 {dimension_numbers = #tpu.dot_dimension_numbers<[1], [0], [0], [1], [0, 0, 1, 1], [], []>} : vector<8x8xf32>, vector<8x8xf32>, vector<8x8xf32> -> vector<8x8xf32>
    %58 = vector.extract_strided_slice %10 {offsets = [0, 16], sizes = [8, 8], strides = [1, 1]} : vector<8x32xf32> to vector<8x8xf32>
    %59 = vector.extract_strided_slice %15 {offsets = [0, 16], sizes = [8, 8], strides = [1, 1]} : vector<8x32xf32> to vector<8x8xf32>
    %60 = vector.extract_strided_slice %20 {offsets = [0, 16], sizes = [8, 8], strides = [1, 1]} : vector<8x32xf32> to vector<8x8xf32>
    %cst_34 = arith.constant dense<0.000000e+00> : vector<8x8xf32>
    %61 = tpu.matmul %58, %59, %cst_34 {dimension_numbers = #tpu.dot_dimension_numbers<[1], [1], [0], [0], [0, 0, 1, 0], [], []>} : vector<8x8xf32>, vector<8x8xf32>, vector<8x8xf32> -> vector<8x8xf32>
    %cst_35 = arith.constant 0.353553385 : f32
    %62 = vector.broadcast %cst_35 : f32 to vector<8x8xf32>
    %63 = arith.mulf %61, %62 : vector<8x8xf32>
    %64 = arith.addf %63, %21 : vector<8x8xf32>
    %cst_36 = arith.constant dense<0xFF800000> : vector<8xf32>
    %65 = vector.multi_reduction <maximumf>, %64, %cst_36 [1] : vector<8x8xf32> to vector<8xf32>
    %66 = vector.shape_cast %65 : vector<8xf32> to vector<8x1xf32>
    %67 = vector.broadcast %66 : vector<8x1xf32> to vector<8x8xf32>
    %68 = arith.subf %64, %67 : vector<8x8xf32>
    %69 = math.exp %68 : vector<8x8xf32>
    %cst_37 = arith.constant dense<0.000000e+00> : vector<8xf32>
    %70 = vector.multi_reduction <add>, %69, %cst_37 [1] : vector<8x8xf32> to vector<8xf32>
    %71 = vector.shape_cast %70 : vector<8xf32> to vector<8x1xf32>
    %72 = tpu.reciprocal %71 {approx = true} : vector<8x1xf32> -> vector<8x1xf32>
    %73 = vector.broadcast %72 : vector<8x1xf32> to vector<8x8xf32>
    %74 = arith.mulf %69, %73 : vector<8x8xf32>
    %cst_38 = arith.constant dense<0.000000e+00> : vector<8x8xf32>
    %75 = tpu.matmul %74, %60, %cst_38 {dimension_numbers = #tpu.dot_dimension_numbers<[1], [0], [0], [1], [0, 0, 1, 1], [], []>} : vector<8x8xf32>, vector<8x8xf32>, vector<8x8xf32> -> vector<8x8xf32>
    %76 = vector.extract_strided_slice %10 {offsets = [0, 24], sizes = [8, 8], strides = [1, 1]} : vector<8x32xf32> to vector<8x8xf32>
    %77 = vector.extract_strided_slice %15 {offsets = [0, 24], sizes = [8, 8], strides = [1, 1]} : vector<8x32xf32> to vector<8x8xf32>
    %78 = vector.extract_strided_slice %20 {offsets = [0, 24], sizes = [8, 8], strides = [1, 1]} : vector<8x32xf32> to vector<8x8xf32>
    %cst_39 = arith.constant dense<0.000000e+00> : vector<8x8xf32>
    %79 = tpu.matmul %76, %77, %cst_39 {dimension_numbers = #tpu.dot_dimension_numbers<[1], [1], [0], [0], [0, 0, 1, 0], [], []>} : vector<8x8xf32>, vector<8x8xf32>, vector<8x8xf32> -> vector<8x8xf32>
    %cst_40 = arith.constant 0.353553385 : f32
    %80 = vector.broadcast %cst_40 : f32 to vector<8x8xf32>
    %81 = arith.mulf %79, %80 : vector<8x8xf32>
    %82 = arith.addf %81, %21 : vector<8x8xf32>
    %cst_41 = arith.constant dense<0xFF800000> : vector<8xf32>
    %83 = vector.multi_reduction <maximumf>, %82, %cst_41 [1] : vector<8x8xf32> to vector<8xf32>
    %84 = vector.shape_cast %83 : vector<8xf32> to vector<8x1xf32>
    %85 = vector.broadcast %84 : vector<8x1xf32> to vector<8x8xf32>
    %86 = arith.subf %82, %85 : vector<8x8xf32>
    %87 = math.exp %86 : vector<8x8xf32>
    %cst_42 = arith.constant dense<0.000000e+00> : vector<8xf32>
    %88 = vector.multi_reduction <add>, %87, %cst_42 [1] : vector<8x8xf32> to vector<8xf32>
    %89 = vector.shape_cast %88 : vector<8xf32> to vector<8x1xf32>
    %90 = tpu.reciprocal %89 {approx = true} : vector<8x1xf32> -> vector<8x1xf32>
    %91 = vector.broadcast %90 : vector<8x1xf32> to vector<8x8xf32>
    %92 = arith.mulf %87, %91 : vector<8x8xf32>
    %cst_43 = arith.constant dense<0.000000e+00> : vector<8x8xf32>
    %93 = tpu.matmul %92, %78, %cst_43 {dimension_numbers = #tpu.dot_dimension_numbers<[1], [0], [0], [1], [0, 0, 1, 1], [], []>} : vector<8x8xf32>, vector<8x8xf32>, vector<8x8xf32> -> vector<8x8xf32>
    %94 = tpu.concatenate %39, %57, %75, %93 in 1 : vector<8x8xf32>, vector<8x8xf32>, vector<8x8xf32>, vector<8x8xf32> -> vector<8x32xf32>
    %c0_44 = arith.constant 0 : index
    %c0_45 = arith.constant 0 : index
    %95 = vector.load %arg10[%c0_44, %c0_45] : memref<32x32xf32, #tpu.memory_space<vmem>>, vector<32x32xf32>
    %cst_46 = arith.constant dense<0.000000e+00> : vector<8x32xf32>
    %96 = tpu.matmul %94, %95, %cst_46 {dimension_numbers = #tpu.dot_dimension_numbers<[1], [0], [0], [1], [0, 0, 1, 1], [], []>} : vector<8x32xf32>, vector<32x32xf32>, vector<8x32xf32> -> vector<8x32xf32>
    %c0_47 = arith.constant 0 : index
    %c0_48 = arith.constant 0 : index
    %97 = vector.load %arg11[%c0_47, %c0_48] : memref<1x32xf32, #tpu.memory_space<vmem>>, vector<1x32xf32>
    %98 = vector.broadcast %97 : vector<1x32xf32> to vector<8x32xf32>
    %99 = arith.addf %96, %98 : vector<8x32xf32>
    %c0_49 = arith.constant 0 : index
    %c0_50 = arith.constant 0 : index
    %c0_51 = arith.constant 0 : index
    %100 = vector.load %arg13[%c0_49, %c0_50, %c0_51] : memref<1x8x32xf32, #tpu.memory_space<vmem>>, vector<1x8x32xf32>
    %101 = vector.shape_cast %100 : vector<1x8x32xf32> to vector<8x32xf32>
    %102 = vector.shape_cast %99 : vector<8x32xf32> to vector<1x8x32xf32>
    tpu.vector_store %arg13[%c0_49, %c0_50, %c0_51], %102 {strides = array<i32>} : memref<1x8x32xf32, #tpu.memory_space<vmem>>, vector<1x8x32xf32>,
    return
  }
  func.func @transform_0(%arg0: i32) -> (i32, i32, i32) {
    %c0_i32 = arith.constant 0 : i32
    %c0_i32_0 = arith.constant 0 : i32
    %c0_i32_1 = arith.constant 0 : i32
    return %arg0, %c0_i32, %c0_i32_0 : i32, i32, i32
  }
  func.func @transform_1(%arg0: i32) -> (i32, i32, i32) {
    %c0_i32 = arith.constant 0 : i32
    %c0_i32_0 = arith.constant 0 : i32
    %c0_i32_1 = arith.constant 0 : i32
    return %arg0, %c0_i32, %c0_i32_0 : i32, i32, i32
  }
  func.func @transform_2(%arg0: i32) -> (i32, i32, i32) {
    %c0_i32 = arith.constant 0 : i32
    %c0_i32_0 = arith.constant 0 : i32
    %c0_i32_1 = arith.constant 0 : i32
    return %arg0, %c0_i32, %c0_i32_0 : i32, i32, i32
  }
  func.func @transform_3(%arg0: i32) -> (i32, i32) {
    %c0_i32 = arith.constant 0 : i32
    %c0_i32_0 = arith.constant 0 : i32
    %c0_i32_1 = arith.constant 0 : i32
    return %c0_i32, %c0_i32_0 : i32, i32
  }
  func.func @transform_4(%arg0: i32) -> (i32, i32) {
    %c0_i32 = arith.constant 0 : i32
    %c0_i32_0 = arith.constant 0 : i32
    %c0_i32_1 = arith.constant 0 : i32
    return %c0_i32, %c0_i32_0 : i32, i32
  }
  func.func @transform_5(%arg0: i32) -> (i32, i32) {
    %c0_i32 = arith.constant 0 : i32
    %c0_i32_0 = arith.constant 0 : i32
    %c0_i32_1 = arith.constant 0 : i32
    return %c0_i32, %c0_i32_0 : i32, i32
  }
  func.func @transform_6(%arg0: i32) -> (i32, i32) {
    %c0_i32 = arith.constant 0 : i32
    %c0_i32_0 = arith.constant 0 : i32
    %c0_i32_1 = arith.constant 0 : i32
    return %c0_i32, %c0_i32_0 : i32, i32
  }
  func.func @transform_7(%arg0: i32) -> (i32, i32) {
    %c0_i32 = arith.constant 0 : i32
    %c0_i32_0 = arith.constant 0 : i32
    %c0_i32_1 = arith.constant 0 : i32
    return %c0_i32, %c0_i32_0 : i32, i32
  }
  func.func @transform_8(%arg0: i32) -> (i32, i32) {
    %c0_i32 = arith.constant 0 : i32
    %c0_i32_0 = arith.constant 0 : i32
    %c0_i32_1 = arith.constant 0 : i32
    return %c0_i32, %c0_i32_0 : i32, i32
  }
  func.func @transform_9(%arg0: i32) -> (i32, i32) {
    %c0_i32 = arith.constant 0 : i32
    %c0_i32_0 = arith.constant 0 : i32
    %c0_i32_1 = arith.constant 0 : i32
    return %c0_i32, %c0_i32_0 : i32, i32
  }
  func.func @transform_10(%arg0: i32) -> (i32, i32) {
    %c0_i32 = arith.constant 0 : i32
    %c0_i32_0 = arith.constant 0 : i32
    %c0_i32_1 = arith.constant 0 : i32
    return %c0_i32, %c0_i32_0 : i32, i32
  }
  func.func @transform_11(%arg0: i32) -> (i32, i32) {
    %c0_i32 = arith.constant 0 : i32
    %c0_i32_0 = arith.constant 0 : i32
    %c0_i32_1 = arith.constant 0 : i32
    return %c0_i32, %c0_i32_0 : i32, i32
  }
  func.func @transform_12(%arg0: i32) -> (i32, i32, i32) {
    %c0_i32 = arith.constant 0 : i32
    %c0_i32_0 = arith.constant 0 : i32
    %c0_i32_1 = arith.constant 0 : i32
    return %arg0, %c0_i32, %c0_i32_0 : i32, i32, i32
  }
}

</mosaic_0001>

<bundles_post_ra>
// kernel: tpu_custom_call.1
= control target key start
LH: loop header
LB: loop body
LE: loop exit
PB: predicated region body
PF: predicated region fallthrough
CT: control target
= control target key end

     0   :  { %s2119_s0 = inlined_call_operand.hbm [shape: f32[2,8,32], index: 0, kind: input, shape index: {}]   ;;  %s2120_s1 = inlined_call_operand.hbm [shape: f32[2,8,32], index: 1, kind: input, shape index: {}]   ;;  %s2121_s2 = inlined_call_operand.hbm [shape: f32[2,8,32], index: 2, kind: input, shape index: {}]   ;;  %s2122_s3 = inlined_call_operand.hbm [shape: f32[32,32], index: 3, kind: input, shape index: {}]   ;;  %s2123_s4 = inlined_call_operand.vmem [shape: f32[1,32], index: 4, kind: input, shape index: {}]   ;;  %s2124_s5 = inlined_call_operand.hbm [shape: f32[32,32], index: 5, kind: input, shape index: {}]   ;;  %s2125_s6 = inlined_call_operand.vmem [shape: f32[1,32], index: 6, kind: input, shape index: {}]   ;;  %s2126_s7 = inlined_call_operand.hbm [shape: f32[32,32], index: 7, kind: input, shape index: {}]   ;;  %s2127_s8 = inlined_call_operand.hbm [shape: f32[1,32], index: 8, kind: input, shape index: {}]   ;;  %s2128_s9 = inlined_call_operand.hbm [shape: f32[32,32], index: 9, kind: input, shape index: {}]   ;;  %s2129_s10 = inlined_call_operand.hbm [shape: f32[1,32], index: 10, kind: input, shape index: {}]   ;;  %s2130_s11 = inlined_call_operand.vmem [shape: f32[8,8], index: 11, kind: input, shape index: {}]   ;;  %s2131_s12 = inlined_call_operand.hbm [shape: f32[2,8,32], index: 12, kind: output, shape index: {}]  }
   0x1   :  { %2144 = sst [smem:[#allocation30_spill]] %s2120_s1 }
   0x2   :  { %2145 = sst [smem:[#allocation31_spill]] %s2122_s3 }
   0x3   :  { %2146 = sst [smem:[#allocation32_spill]] %s2126_s7 }
   0x4   :  { %2147 = sst [smem:[#allocation33_spill]] %s2128_s9 }
   0x5   :  { %2148 = sst [smem:[#allocation34_spill]] %s2130_s11 }
   0x6   :  { %2149 = sst [smem:[#allocation35_spill]] %s2131_s12 }
   0x7   :  { %17 = vsyncpa [#allocation3], 0 }
   0x8   :  { %19 = vsyncpa [#allocation3 + $0x1], 0 }
   0x9   :  { %20 = vsyncpa [#allocation6], 0 }
   0xa   :  { %22 = vsyncpa [#allocation6 + $0x1], 0 }
   0xb   :  { %23 = vsyncpa [#allocation9], 0 }
   0xc   :  { %24 = vsyncpa [#allocation12], 0 }
   0xd   :  { %25 = vsyncpa [#allocation15], 0 }
   0xe   :  { %26 = vsyncpa [#allocation4], 0 }
   0xf   :  { %28 = vsyncpa [#allocation4 + $0x1], 0  ;;  %s1823_s21 = smov 0   ;;  %s1825_s22 = smov 0  }
  0x10   :  { %s1827_s23 = smov 0   ;;  %s1829_s24 = smov 0  }
  0x11 LB: > { %2150 = sst [smem:[#allocation24_spill]] %s1730_s21  ;;  %s1847_s28 = sadd.s32 4294967295, %s1742_s24   ;;  %s1742_s24 = sphi %s1829_s24, %s2182_s24   ;;  %s1738_s23 = sphi %s1827_s23, %s2186_s23   ;;  %s1734_s22 = sphi %s1825_s22, %s2185_s22   ;;  %s1730_s21 = sphi %s1823_s21, %s2184_s21  }
  0x12   : > { %2151 = sst [smem:[#allocation25_spill]] %s1742_s24  ;;  %p1200_p0 = scmp.ge.s32.totalorder %s1742_s24, 1 }
  0x13   : > { %s2152_s3 = sld [smem:[#allocation31_spill]]  ;;  %p2143_p1 = scmp.eq.s32.totalorder %s1847_s28, 0 }
  0x14   : > { %p332_p2 = scmp.lt.s32.totalorder %s1742_s24, 3  ;;  %s1744_s30 = smov [#allocation8]  }
  0x15   : > { %s345_s13 = sshll.u32 %s1744_s30, 4  ;;  %s2154_s7 = sld [smem:[#allocation32_spill]]  ;;  %s346_s13 = int_to_ptr.vmem [resolvable:$true] %s345_s13 }
  0x16   : > { %p1852_p3 = pnand %p1200_p0, %p332_p2  ;;  %s2156_s9 = sld [smem:[#allocation33_spill]] }
  0x17   : > { %s1745_s25 = smov [#allocation11]   ;;  %s2132_s30 = smov 128  }
  0x18   : > { %p1277_p4 = pneg %p1852_p3  ;;  %s379_s26 = sshll.u32 %s1745_s25, 4  ;;  %s380_s26 = int_to_ptr.vmem [resolvable:$true] %s379_s26 }
  0x19   : > { %s343_s27 = sshll.u32 %s2152_s3, 4  ;;  %s2133_s14 = smov 8   ;;  %s344_s27 = int_to_ptr.hbm [resolvable:$true] %s343_s27 }
  0x1a   : > { %p1864_p6 = pnand %p1277_p4, %p2143_p1  ;;  %s1748_s15 = smov [#allocation14]  }
  0x1b   : > { %s377_s16 = sshll.u32 %s2154_s7, 4  ;;  %s405_s18 = sshll.u32 %s1748_s15, 4  ;;  %s378_s16 = int_to_ptr.hbm [resolvable:$true] %s377_s16  ;;  %s406_s18 = int_to_ptr.vmem [resolvable:$true] %s405_s18 }
  0x1c   : > { %s403_s20 = sshll.u32 %s2156_s9, 4  ;;  %s41_s19 = sadd.s32 1, %s1738_s23  ;;  %s404_s20 = int_to_ptr.hbm [resolvable:$true] %s403_s20 }
  0x1d   : > { %1280 = dma.hbm_to_vmem [thread:$0]  (!%p1864_p6), %s344_s27, 512, %s346_s13, [#allocation9], %s2132_s30, %s2132_s30, %s2133_s14  }
  0x1e   : > { %1286 = dma.hbm_to_vmem [thread:$0]  (!%p1864_p6), %s378_s16, 512, %s380_s26, [#allocation12], %s2132_s30, %s2132_s30, %s2133_s14  }
  0x1f   : > { %1292 = dma.hbm_to_vmem [thread:$0]  (!%p1864_p6), %s404_s20, 512, %s406_s18, [#allocation15], %s2132_s30, %s2132_s30, %s2133_s14  }
  0x20   : > { %s1199_s27 = sadd.s32 4294967294, %s1742_s24   ;;  %s1888_s13 = sadd.s32 1, %s1742_s24  }
  0x21   : > { %2157 = sst [smem:[#allocation26_spill]] %s1888_s13  ;;  %s38_s25 = ssub.s32 %s1742_s24, %s1888_s13 }
  0x22   : > { %p48_p7 = scmp.ne.s32.totalorder %s1738_s23, %s1734_s22  ;;  %p39_p8 = scmp.eq.s32.totalorder %s38_s25, 0 }
  0x23   : > { %p49_p9 = scmp.eq.s32.totalorder %s1742_s24, 0  ;;  %p54_p10 = scmp.ne.s32.totalorder %s1734_s22, %s1730_s21 }
  0x24   : > { %p319_p11 = scmp.eq.s32.totalorder %s1847_s28, 1  ;;  %p325_p2 = scmp.eq.s32.totalorder %s1199_s27, 1 }
  0x25   : > { %s1900_s16 = scalar_select %p39_p8, %s1738_s23, %s41_s19  }
  0x26   : > { %p50_p12 = por %p49_p9, %p48_p7  ;;  %p1904_p13 = por %p2143_p1, %p54_p10 }
  0x27   : > { %2158 = sst [smem:[#allocation27_spill]] %s1900_s16  ;;  %p1908_p0 = por %p319_p11, %p48_p7 }
  0x28   : > { %p1316_p4 = scmp.lt.s32.totalorder %s1742_s24, 2  ;;  %s2136_s15 = sand.u32 1, %s1738_s23  }
  0x29   : > { %s2160_s26 = scalar_select %p1908_p0, 1, 0 }
  0x2a   : > { %p1914_p5 = por %p325_p2, %p54_p10  ;;  %s1920_s19 = sshll.u32 %s2136_s15, 3 }
  0x2b   : > { %2161 = sst [smem:[#allocation28_spill]] %s2160_s26  ;;  %s1923_s25 = sshll.u32 %s1742_s24, 3 }
  0x2c   : > { %s2162_s18 = scalar_select %p1914_p5, 1, 0 }
  0x2d   : > { %p1925_p8 = pnand %p1316_p4, %p50_p12  ;;  %s453_s27 = sand.u32 1, %s1742_s24  }
  0x2e   : > { %2163 = sst [smem:[#allocation29_spill]] %s2162_s18  ;;  %s457_s9 = scalar_lea.vmem [#allocation5], %s1920_s19 }
  0x2f   : > { %s2165_s1 = sld [smem:[#allocation30_spill]]  ;;  %s465_s16 = sshll.u32 %s457_s9, 4  ;;  %s466_s16 = int_to_ptr.vmem [resolvable:$true] %s465_s16 }
  0x30   : > { %s360_s21 = sshll.u32 %s2124_s5, 4  ;;  %s1938_s26 = scalar_lea.sflag [#allocation6], %s453_s27  ;;  %s361_s21 = int_to_ptr.hbm [resolvable:$true] %s360_s21 }
  0x31   : > { %p1484_p9 = pneg %p1925_p8 }
  0x35   : > { %s461_s7 = scalar_lea.hbm %s2165_s1, %s1923_s25  ;;  %s1487_s9 = scalar_lea.hbm %s2165_s1, 16 }
  0x36   : > { %s463_s13 = sshll.u32 %s461_s7, 4  ;;  %s464_s13 = int_to_ptr.hbm [resolvable:$true] %s463_s13 }
  0x37   : > { %s1480_s12 = sshra.s32 %s464_s13, 4  ;;  %s1481_s12 = int_to_ptr.hbm [resolvable:$true] %s1480_s12 }
  0x38   : > { %s1482_s11 = scalar_lea.hbm %s1481_s12, 8  ;;  %p1488_p12 = scmp.lt.s32.totalorder %s1481_s12, %s2165_s1 }
  0x39   : > { %p1483_p7 = scmp.ne.s32.totalorder %s1481_s12, %s1482_s11  ;;  %p1489_p2 = scmp.lt.s32.totalorder %s1487_s9, %s1482_s11 }
  0x3b   : > { %p1485_p10 = pnand %p1484_p9, %p1483_p7  ;;  %p1490_p4 = por %p1489_p2, %p1488_p12 }
  0x3d   : > { %p1486_p11 = pneg %p1485_p10 }
  0x3f   : > { %p1491_p1 = pnand %p1490_p4, %p1486_p11 }
  0x41   : > { %1494 = shalt.err (!%p1491_p1)
}
  0x42   : > { %1302 = dma.hbm_to_vmem [thread:$0]  (!%p1925_p8), %s464_s13, 128, %s466_s16, %s1938_s26  }
  0x43   : > { %s1749_s15 = smov [#allocation10]   ;;  %s392_s12 = sshll.u32 %s2127_s8, 4  ;;  %s393_s12 = int_to_ptr.hbm [resolvable:$true] %s392_s12 }
  0x44   : > { %s362_s18 = sshll.u32 %s1749_s15, 4  ;;  %s2166_s11 = smov 8   ;;  %s363_s18 = int_to_ptr.vmem [resolvable:$true] %s362_s18 }
  0x45   : > { %s2167_s24 = smov 128   ;;  %s418_s13 = sshll.u32 %s2129_s10, 4  ;;  %s419_s13 = int_to_ptr.hbm [resolvable:$true] %s418_s13 }
  0x46   : > { %1283 = dma.hbm_to_vmem [thread:$0]  (!%p1864_p6), %s361_s21, 512, %s363_s18, [#allocation9], %s2167_s24, %s2167_s24, %s2166_s11  }
  0x47   : > { %s1750_s16 = smov [#allocation13]   ;;  %s1751_s15 = smov [#allocation16]  }
  0x48   : > { %s394_s14 = sshll.u32 %s1750_s16, 4  ;;  %s420_s27 = sshll.u32 %s1751_s15, 4  ;;  %s395_s14 = int_to_ptr.vmem [resolvable:$true] %s394_s14  ;;  %s421_s27 = int_to_ptr.vmem [resolvable:$true] %s420_s27 }
  0x49   : > { %1289 = dma.hbm_to_vmem [thread:$0]  (!%p1864_p6), %s393_s12, 16, %s395_s14, [#allocation12]  }
  0x4a   : > { %1295 = dma.hbm_to_vmem [thread:$0]  (!%p1864_p6), %s419_s13, 16, %s421_s27, [#allocation15]  }
  0x4b   : > { %s442_s21 = scalar_lea.hbm %s2119_s0, %s1923_s25  ;;  %s438_s18 = scalar_lea.vmem [#allocation2], %s1920_s19 }
  0x4c   : > { %s446_s11 = sshll.u32 %s438_s18, 4  ;;  %s444_s24 = sshll.u32 %s442_s21, 4  ;;  %s447_s11 = int_to_ptr.vmem [resolvable:$true] %s446_s11  ;;  %s445_s24 = int_to_ptr.hbm [resolvable:$true] %s444_s24 }
  0x4d   : > { %s2168_s7 = sand.u32 1, %s1738_s23   ;;  %s1600_s16 = sshra.s32 %s445_s24, 4  ;;  %s1601_s16 = int_to_ptr.hbm [resolvable:$true] %s1600_s16 }
  0x4e   : > { %s435_s9 = scalar_lea.sflag [#allocation3], %s2168_s7  ;;  %s1602_s12 = scalar_lea.hbm %s1601_s16, 8 }
  0x4f   : > { %p1603_p1 = scmp.ne.s32.totalorder %s1601_s16, %s1602_s12  ;;  %s1607_s1 = scalar_lea.hbm %s2119_s0, 16 }
  0x50   : > { %p1608_p6 = scmp.lt.s32.totalorder %s1601_s16, %s2119_s0  ;;  %p1609_p11 = scmp.lt.s32.totalorder %s1607_s1, %s1602_s12 }
  0x51   : > { %p1605_p7 = pnand %p1603_p1, %p1484_p9 }
  0x52   : > { %p1610_p12 = por %p1609_p11, %p1608_p6 }
  0x53   : > { %p1606_p10 = pneg %p1605_p7 }
  0x55   : > { %p1611_p2 = pnand %p1610_p12, %p1606_p10 }
  0x57   : > { %1614 = shalt.err (!%p1611_p2)
}
  0x58   : > { %1299 = dma.hbm_to_vmem [thread:$0]  (!%p1925_p8), %s445_s24, 128, %s447_s11, %s435_s9  }
  0x59   : > { %s480_s21 = scalar_lea.hbm %s2121_s2, %s1923_s25  ;;  %s476_s18 = scalar_lea.vmem [#allocation7], %s1920_s19 }
  0x5a   : > { %s484_s7 = sshll.u32 %s476_s18, 4  ;;  %s482_s17 = sshll.u32 %s480_s21, 4  ;;  %s485_s7 = int_to_ptr.vmem [resolvable:$true] %s484_s7  ;;  %s483_s17 = int_to_ptr.hbm [resolvable:$true] %s482_s17 }
  0x5b   : > { %s1630_s16 = sshra.s32 %s483_s17, 4  ;;  %s1637_s11 = scalar_lea.hbm %s2121_s2, 16  ;;  %s1631_s16 = int_to_ptr.hbm [resolvable:$true] %s1630_s16 }
  0x5c   : > { %s1632_s12 = scalar_lea.hbm %s1631_s16, 8  ;;  %p1638_p10 = scmp.lt.s32.totalorder %s1631_s16, %s2121_s2 }
  0x5d   : > { %p1633_p4 = scmp.ne.s32.totalorder %s1631_s16, %s1632_s12  ;;  %p1639_p6 = scmp.lt.s32.totalorder %s1637_s11, %s1632_s12 }
  0x5f   : > { %p1635_p1 = pnand %p1633_p4, %p1484_p9  ;;  %p1640_p11 = por %p1639_p6, %p1638_p10 }
  0x61   : > { %p1636_p7 = pneg %p1635_p1 }
  0x63   : > { %p1641_p12 = pnand %p1640_p11, %p1636_p7 }
  0x65   : > { %1644 = shalt.err (!%p1641_p12)
}
  0x66   : > { %1305 = dma.hbm_to_vmem [thread:$0]  (!%p1925_p8), %s483_s17, 128, %s485_s7, %s1938_s26  }
  0x67   : > { %493 = sbr.rel (%p1852_p3) target bundleno = 1162 (0x48a), region = 68  ;;  %s2007_s19 = sand.u32 (!%p1852_p3), 1, %s1734_s22  }
  0x68   : > { %s2010_s25 = sshll.u32 (!%p1852_p3), %s2007_s19, 3  ;;  %s496_s14 = scalar_lea.sflag (!%p1852_p3), [#allocation3], %s2007_s19 }
  0x69   : > { %s499_s15 = scalar_lea.vmem (!%p1852_p3), [#allocation2], %s2010_s25 }
  0x6c   : > { %1705 = dma.done.wait (%p1904_p13), %s496_s14, 128  }
  0x6d   : > { %1707 = vsyncadd (%p1904_p13), %s496_s14, 4294967168  ;;  %s505_s29 = sand.u32 1, %s1847_s28   ;;  %s509_s26 = scalar_lea.vmem [#allocation5], %s2010_s25 }
  0x6e   : > { %s506_s30 = scalar_lea.sflag [#allocation6], %s505_s29 }
  0x6f   : > { %1709 = dma.done.wait (%p1904_p13), %s506_s30, 256  }
  0x70   : > { %1711 = vsyncadd (%p1904_p13), %s506_s30, 4294967040  ;;  %s519_s27 = scalar_lea.vmem [#allocation7], %s2010_s25  ;;  %p2169_p3 = scmp.eq.s32.totalorder %s1847_s28, 0 }
  0x72   : > { %1713 = dma.done.wait (%p2169_p3), [#allocation9], 1024   ;;  %p2170_p8 = pmov %p2169_p3 }
  0x73   : > { %p2171_p9 = pmov %p2169_p3 }
  0x74   : > { %1715 = vsyncadd (%p2170_p8), [#allocation9], 4294966272 }
  0x75   : > { %1717 = dma.done.wait (%p2171_p9), [#allocation12], 528   ;;  %p2172_p2 = pmov %p2169_p3 }
  0x77   : > { %1719 = vsyncadd (%p2172_p2), [#allocation12], 4294966768  ;;  %p2173_p4 = pmov %p2172_p2 }
  0x78   : > { %p2174_p1 = pmov %p2172_p2 }
  0x79   : > { %1721 = dma.done.wait (%p2173_p4), [#allocation15], 528  }
  0x7a   : > { %1723 = vsyncadd (%p2174_p1), [#allocation15], 4294966768  ;;  %v639_v0 = vld [vmem:[#allocation10 + $0x18] sm:$0xff]  ;;  %v638_v1 = vld [vmem:[#allocation10 + $0x10] sm:$0xff]  ;;  %vm612_vm0 = vcmask 261120   ;;  %vm699_vm1 = vcmask 64512  }
  0x7b   : > { %v607_v2 = vld [vmem:[#allocation8 + $0x18] sm:$0xff]  ;;  %659 = vmatpush.msra.mxu1 %v639_v0  ;;  %v606_v3 = vld [vmem:[#allocation8 + $0x10] sm:$0xff]  ;;  %v637_v4 = vld [vmem:[#allocation10 + $0x8] sm:$0xff]  ;;  %s1752_s7 = smov 104   ;;  %s1753_s17 = smov 120   ;;  %vm977_vm2 = vcmask 130048  }
  0x7c   : > { %628 = vmatpush.msra.mxu0 %v607_v2  ;;  %v605_v5 = vld [vmem:[#allocation8 + $0x8] sm:$0xff]  ;;  %v636_v6 = vld [vmem:[#allocation10] sm:$0xff]  ;;  %v601_v9 = vld [vmem:[%s499_s15] sm:$0xff]  ;;  %s1754_s16 = smov 112   ;;  %s2175_s1 = sld [smem:[#allocation34_spill]]  ;;  %vm979_vm3 = vcmask 195584  }
  0x7d   : > { %660 = vmatpush.msra.mxu1 %v638_v1  ;;  %v604_v7 = vld [vmem:[#allocation8] sm:$0xff]  ;;  %v1370_v10 = vld [vmem:[%s2125_s6] ss:$0 sm:$0xff]  ;;  %v670_v16 = vld [vmem:[#allocation11 + $0x18] sm:$0xff]  ;;  %s1755_s11 = smov 16   ;;  %s1756_s24 = smov 8  }
  0x7e   : > { %629 = vmatpush.msra.mxu0 %v606_v3  ;;  %v602_v8 = vld [vmem:[%s509_s26] sm:$0xff]  ;;  %v1371_v11 = vld [vmem:[%s2123_s4] ss:$0 sm:$0xff]  ;;  %690 = vmatpush.msra.mxu2 %v670_v16  ;;  %s1757_s9 = smov 24   ;;  %s1242_s14 = sshll.u32 %s1847_s28, 3 }
  0x7f   : > { %661 = vmatpush.msra.mxu1 %v637_v4  ;;  %v669_v17 = vld [vmem:[#allocation11 + $0x10] sm:$0xff]  ;;  %v668_v18 = vld [vmem:[#allocation11 + $0x8] sm:$0xff]  ;;  %v667_v19 = vld [vmem:[#allocation11] sm:$0xff]  ;;  %s2176_s30 = sld [smem:[#allocation35_spill]]  ;;  %s600_s20 = scalar_lea.vmem [#allocation17], %s2010_s25 }
  0x80   : > { %630 = vmatpush.msra.mxu0 %v605_v5  ;;  %691 = vmatpush.msra.mxu2 %v669_v17  ;;  %v603_v20 = vld [vmem:[%s519_s27] sm:$0xff]  ;;  %v1372_v32 = vld [vmem:[#allocation13] ss:$0 sm:$0xff]  ;;  %s1026_s3 = sshll.u32 %s600_s20, 4  ;;  %s1014_s18 = scalar_lea.sflag [#allocation4], %s2007_s19  ;;  %s1027_s3 = int_to_ptr.vmem [resolvable:$true] %s1026_s3 }
  0x81   : > { %662 = vmatpush.msra.mxu1 %v636_v6 }
  0x82   : > { %631 = vmatpush.msra.mxu0 %v604_v7  ;;  %1226 = vmatmul.msk.f32.vlgmr.msra.gmra.mxu1 %vm612_vm0, %v602_v8  ;;  %v698_v28 = vld [vmem:[%s2175_s1] sm:$0xff] }
  0x83   : > { %1225 = vmatmul.msk.f32.vlgmr.msra.gmra.mxu0 %vm612_vm0, %v601_v9  ;;  %692 = vmatpush.msra.mxu2 %v668_v18 }
  0x85   : > { %693 = vmatpush.msra.mxu2 %v667_v19  ;;  %s1024_s27 = scalar_lea.hbm %s2176_s30, %s1242_s14  ;;  %s1680_s25 = scalar_lea.hbm %s2176_s30, 16 }
  0x86   : > { %1227 = vmatmul.msk.f32.vlgmr.msra.gmra.mxu2 %vm612_vm0, %v603_v20  ;;  %s1028_s21 = sshll.u32 %s1024_s27, 4  ;;  %s1029_s21 = int_to_ptr.hbm [resolvable:$true] %s1028_s21 }
  0xff   : > { %v664_v12 = vpop.f32.mrf.mxu1 }
 0x100   : > { %v633_v13 = vpop.f32.mrf.mxu0  ;;  %v665_v14 = vadd.f32 %v1370_v10, %v664_v12 }
 0x101   : > { %v634_v15 = vadd.f32 %v1371_v11, %v633_v13 }
 0x102   : > { %899 = vrot.lane.b32.xlu2 %v665_v14, %s1752_s7  ;;  %764 = vrot.lane.b32.xlu1 %v665_v14, %s1753_s17 }
 0x103   : > { %832 = vrot.lane.b32.xlu0 %v665_v14, %s1754_s16  ;;  %1228 = vmatpush.xpose.msk.msra.mxu3 %vm699_vm1, %v665_v14 }
 0x106   : > { %1229 = vmatmul.msk.f32.vlgmr.msra.gmra.mxu3 %vm699_vm1, %v634_v15 }
 0x109   : > { %v695_v33 = vpop.f32.mrf.mxu2 }
 0x10a   : > { %897 = vrot.lane.b32.xlu2 %v634_v15, %s1752_s7  ;;  %762 = vrot.lane.b32.xlu1 %v634_v15, %s1753_s17  ;;  %v696_v34 = vadd.f32 %v1372_v32, %v695_v33  ;;  %v1373_v32 = vld [vmem:[#allocation16] ss:$0 sm:$0xff] }
 0x10b   : > { %830 = vrot.lane.b32.xlu0 %v634_v15, %s1754_s16 }
 0x10c   : > { %757 = vmatpush.msrb.mxu3 %v696_v34 }
 0x15c   : > { %v900_v22 = vpop.permute.xlu2 %899 }
 0x164   : > { %v898_v26 = vpop.permute.xlu2 %897 }
 0x174   : > { %v765_v21 = vpop.permute.xlu1 %764 }
 0x175   : > { %v833_v23 = vpop.permute.xlu0 %832  ;;  %1231 = vmatpush.xpose.msk.msrb.mxu0 %vm699_vm1, %v765_v21 }
 0x176   : > { %1234 = vmatpush.xpose.msk.msrb.mxu2 %vm699_vm1, %v833_v23  ;;  %v983_v23 = vld [vmem:[#allocation14 + $0x10] sm:$0xff] }
 0x179   : > { %1237 = vmatpush.xpose.msk.msra.mxu0 %vm699_vm1, %v900_v22  ;;  %v984_v22 = vld [vmem:[#allocation14 + $0x18] sm:$0xff] }
 0x17a   : > { %1004 = vmatpush.msra.mxu2 %v984_v22 }
 0x17c   : > { %v763_v24 = vpop.permute.xlu1 %762  ;;  %1005 = vmatpush.msra.mxu2 %v983_v23 }
 0x17d   : > { %v831_v25 = vpop.permute.xlu0 %830  ;;  %1232 = vmatmul.msk.f32.vlgmr.msrb.gmra.mxu0 %vm699_vm1, %v763_v24  ;;  %v982_v24 = vld [vmem:[#allocation14 + $0x8] sm:$0xff] }
 0x17e   : > { %1235 = vmatmul.msk.f32.vlgmr.msrb.gmra.mxu2 %vm699_vm1, %v831_v25  ;;  %v981_v25 = vld [vmem:[#allocation14] sm:$0xff] }
 0x17f   : > { %1006 = vmatpush.msra.mxu2 %v982_v24 }
 0x181   : > { %1007 = vmatpush.msra.mxu2 %v981_v25 }
 0x185   : > { %1238 = vmatmul.msk.f32.vlgmr.msra.gmra.mxu0 %vm699_vm1, %v898_v26 }
 0x189   : > { %v723_v27 = vpop.f32.mrf.mxu3 }
 0x18a   : > { %v726_v29 = vmul.f32 0.35355338, %v723_v27 }
 0x18c   : > { %v727_v30 = vadd.f32 %v726_v29, %v698_v28 }
 0x18e   : > { %v728_v31 = vsel %vm699_vm1, %v727_v30, -inf }
 0x18f   : > { %729 = vmax.xlane.f32.xlu0 %v728_v31 }
 0x1fa   : > { %v787_v35 = vpop.f32.mrf.mxu0 }
 0x1fb   : > { %v790_v36 = vmul.f32 0.35355338, %v787_v35 }
 0x1fd   : > { %v791_v37 = vadd.f32 %v790_v36, %v698_v28 }
 0x1ff   : > { %v792_v38 = vsel %vm699_vm1, %v791_v37, -inf }
 0x200   : > { %793 = vmax.xlane.f32.xlu1 %v792_v38 }
 0x201   : > { %v855_v39 = vpop.f32.mrf.mxu2 }
 0x202   : > { %v858_v40 = vmul.f32 0.35355338, %v855_v39  ;;  %v730_v41 = vpop.xlane.xlu0 %729  ;;  %v922_v43 = vpop.f32.mrf.mxu0 }
 0x203   : > { %v731_v42 = vsub.f32 %v727_v30, %v730_v41  ;;  %v925_v46 = vmul.f32 0.35355338, %v922_v43 }
 0x204   : > { %v859_v44 = vadd.f32 %v858_v40, %v698_v28 }
 0x205   : > { %v732_v45 = vmul.f32 1.442695, %v731_v42  ;;  %v926_v48 = vadd.f32 %v925_v46, %v698_v28 }
 0x206   : > { %v860_v47 = vsel %vm699_vm1, %v859_v44, -inf }
 0x207   : > { %1374 = vpow2.f32 %v732_v45  ;;  %861 = vmax.xlane.f32.xlu2 %v860_v47  ;;  %v927_v50 = vsel %vm699_vm1, %v926_v48, -inf }
 0x20d   : > { %v1375_v49 = vpop.eup %1374 }
 0x20e   : > { %v734_v51 = vsel %vm699_vm1, %v1375_v49, 0.0 }
 0x20f   : > { %928 = vmax.xlane.f32.xlu2 %v927_v50  ;;  %735 = vadd.xlane.f32.xlu0 %v734_v51 }
 0x273   : > { %v794_v52 = vpop.xlane.xlu1 %793 }
 0x274   : > { %v795_v53 = vsub.f32 %v791_v37, %v794_v52 }
 0x276   : > { %v796_v54 = vmul.f32 1.442695, %v795_v53 }
 0x278   : > { %1376 = vpow2.f32 %v796_v54 }
 0x27a   : > { %v862_v55 = vpop.xlane.xlu2 %861 }
 0x27b   : > { %v863_v56 = vsub.f32 %v859_v44, %v862_v55 }
 0x27d   : > { %v864_v57 = vmul.f32 1.442695, %v863_v56 }
 0x27e   : > { %v1377_v58 = vpop.eup %1376 }
 0x27f   : > { %1378 = vpow2.f32 %v864_v57  ;;  %v798_v59 = vsel %vm699_vm1, %v1377_v58, 0.0 }
 0x280   : > { %799 = vadd.xlane.f32.xlu1 %v798_v59 }
 0x282   : > { %v929_v60 = vpop.xlane.xlu2 %928  ;;  %v736_v61 = vpop.xlane.xlu0 %735 }
 0x283   : > { %v930_v62 = vsub.f32 %v926_v48, %v929_v60  ;;  %1380 = vrcp.f32 %v736_v61 }
 0x285   : > { %v1379_v63 = vpop.eup %1378  ;;  %v931_v0 = vmul.f32 1.442695, %v930_v62 }
 0x286   : > { %v866_v1 = vsel %vm699_vm1, %v1379_v63, 0.0 }
 0x287   : > { %1382 = vpow2.f32 %v931_v0  ;;  %867 = vadd.xlane.f32.xlu2 %v866_v1 }
 0x289   : > { %v1381_v2 = vpop.eup %1380 }
 0x28a   : > { %v738_v3 = vmul.f32 %v1381_v2, %v1375_v49 }
 0x28c   : > { %1230 = vmatmul.msk.f32.vlgmr.msrb.gmra.mxu3 %vm699_vm1, %v738_v3 }
 0x28d   : > { %v1383_v4 = vpop.eup %1382 }
 0x28e   : > { %v933_v5 = vsel %vm699_vm1, %v1383_v4, 0.0 }
 0x28f   : > { %934 = vadd.xlane.f32.xlu0 %v933_v5 }
 0x299   : > { %804 = vrot.lane.b32.xlu1 %v696_v34, %s1753_s17 }
 0x29f   : > { %871 = vrot.lane.b32.xlu2 %v696_v34, %s1754_s16 }
 0x2a3   : > { %938 = vrot.lane.b32.xlu0 %v696_v34, %s1752_s7  ;;  %s1674_s7 = sshra.s32 %s1029_s21, 4  ;;  %s1675_s7 = int_to_ptr.hbm [resolvable:$true] %s1674_s7 }
 0x2a4   : > { %s1676_s17 = scalar_lea.hbm %s1675_s7, 8  ;;  %p1681_p6 = scmp.lt.s32.totalorder %s1675_s7, %s2176_s30 }
 0x2a5   : > { %p1677_p13 = scmp.ne.s32.totalorder %s1675_s7, %s1676_s17  ;;  %p1682_p11 = scmp.lt.s32.totalorder %s1680_s25, %s1676_s17 }
 0x2a7   : > { %p1678_p7 = pnand %p1677_p13, %p1908_p0  ;;  %p1683_p12 = por %p1682_p11, %p1681_p6 }
 0x2a9   : > { %p1679_p10 = pneg %p1678_p7 }
 0x2ab   : > { %p1684_p3 = pnand %p1683_p12, %p1679_p10 }
 0x2f3   : > { %v800_v7 = vpop.xlane.xlu1 %799 }
 0x2fa   : > { %v868_v6 = vpop.xlane.xlu2 %867 }
 0x2fb   : > { %1384 = vrcp.f32 %v868_v6 }
 0x2fc   : > { %1386 = vrcp.f32 %v800_v7 }
 0x301   : > { %v1385_v8 = vpop.eup %1384 }
 0x302   : > { %v870_v9 = vmul.f32 %v1385_v8, %v1379_v63  ;;  %v872_v10 = vpop.permute.xlu2 %871  ;;  %v1387_v11 = vpop.eup %1386 }
 0x303   : > { %892 = vmatpush.msra.mxu3 %v872_v10  ;;  %v935_v12 = vpop.xlane.xlu0 %934  ;;  %v802_v14 = vmul.f32 %v1387_v11, %v1377_v58 }
 0x304   : > { %1236 = vmatmul.msk.f32.vlgmr.msra.gmra.mxu3 %vm699_vm1, %v870_v9  ;;  %1388 = vrcp.f32 %v935_v12 }
 0x30a   : > { %v1389_v15 = vpop.eup %1388 }
 0x30b   : > { %v805_v13 = vpop.permute.xlu1 %804  ;;  %v937_v16 = vmul.f32 %v1389_v15, %v1383_v4 }
 0x30c   : > { %825 = vmatpush.msrb.mxu1 %v805_v13 }
 0x30d   : > { %1233 = vmatmul.msk.f32.vlgmr.msrb.gmra.mxu1 %vm699_vm1, %v802_v14 }
 0x30f   : > { %v759_v18 = vpop.f32.mrf.mxu3 }
 0x315   : > { %v939_v17 = vpop.permute.xlu0 %938 }
 0x316   : > { %959 = vmatpush.msra.mxu1 %v939_v17 }
 0x317   : > { %1239 = vmatmul.msk.f32.vlgmr.msra.gmra.mxu1 %vm699_vm1, %v937_v16 }
 0x387   : > { %v894_v19 = vpop.f32.mrf.mxu3 }
 0x388   : > { %969 = vrot.lane.b32.xlu0 %v894_v19, %s1755_s11 }
 0x38a   : > { %v827_v20 = vpop.f32.mrf.mxu1 }
 0x38b   : > { %965 = vrot.lane.b32.xlu1 %v827_v20, %s1756_s24 }
 0x394   : > { %v961_v21 = vpop.f32.mrf.mxu1 }
 0x395   : > { %973 = vrot.lane.b32.xlu2 %v961_v21, %s1757_s9 }
 0x3ef   : > { %v974_v29 = vpop.permute.xlu2 %973 }
 0x3fa   : > { %v970_v27 = vpop.permute.xlu0 %969 }
 0x3fd   : > { %v966_v26 = vpop.permute.xlu1 %965 }
 0x3fe   : > { %v976_v28 = vsel %vm699_vm1, %v759_v18, %v966_v26 }
 0x3ff   : > { %v978_v30 = vsel %vm977_vm2, %v976_v28, %v970_v27 }
 0x400   : > { %v980_v31 = vsel %vm979_vm3, %v978_v30, %v974_v29 }
 0x401   : > { %1240 = vmatmul.msk.f32.vlgmr.msra.gmra.mxu2 %vm612_vm0, %v980_v31 }
 0x484   : > { %v1009_v33 = vpop.f32.mrf.mxu2 }
 0x485   : > { %v1010_v34 = vadd.f32 %v1373_v32, %v1009_v33 }
 0x487   : > { %1012 = vst.msk [vmem:[%s600_s20] sm:$0xff] %vm612_vm0, %v1010_v34 }
 0x488   : > { %1687 = shalt.err (!%p1684_p3)
}
 0x489   : > { %1275 = dma.vmem_to_hbm [thread:$0]  (%p1908_p0), %s1027_s3, 128, %s1029_s21, %s1014_s18  }
 0x48a PF: > { %s2178_s19 = sld [smem:[#allocation24_spill]] }
 0x48b   : > { %s2180_s11 = sld [smem:[#allocation25_spill]] }
 0x490   : > { %s1040_s24 = sand.u32 1, %s2178_s19  }
 0x491   : > { %p2181_p8 = scmp.ge.s32.totalorder %s2180_s11, 2  ;;  %s1041_s9 = scalar_lea.sflag [#allocation4], %s1040_s24 }
 0x493   : > { %p1307_p9 = pnand %p2181_p8, %p1914_p5 }
 0x495   : > { %p1308_p2 = pneg %p1307_p9 }
 0x497   : > { %1725 = dma.done.wait (%p1308_p2), %s1041_s9, 128  }
 0x498   : > { %1727 = vsyncadd (%p1308_p2), %s1041_s9, 4294967168  ;;  %s2182_s24 = sld [smem:[#allocation26_spill]]  ;;  %s2184_s21 = smov %s1734_s22 }
 0x499   : > { %s2183_s14 = sld [smem:[#allocation27_spill]]  ;;  %s2185_s22 = smov %s1738_s23 }
 0x49e   : > { %p31_p4 = scmp.ge.s32.totalorder %s2182_s24, 4  }
 0x49f   : > { %s2186_s23 = smov %s2183_s14 }
 0x4a0   :  { %33 = sbr.rel (!%p31_p4) target bundleno = 17 (0x11), region = 161 }
 0x4a5   :  { %1047 = vsyncpa [#allocation3], 1 }
 0x4a6   :  { %1049 = vsyncpa [#allocation3 + $0x1], 1 }
 0x4a7   :  { %1050 = vsyncpa [#allocation6], 1 }
 0x4a8   :  { %1052 = vsyncpa [#allocation6 + $0x1], 1 }
 0x4a9   :  { %1053 = vsyncpa [#allocation9], 1 }
 0x4aa   :  { %1054 = vsyncpa [#allocation12], 1 }
 0x4ab   :  { %1055 = vsyncpa [#allocation15], 1 }
 0x4ac   :  { %1056 = vsyncpa [#allocation4], 1 }
 0x4ad   :  { %1058 = vsyncpa [#allocation4 + $0x1], 1 }

</bundles_post_ra>
